<compile_context>
chip_gen: v6e
topology: v6e:2x2x1
jax: 0.10.0
libtpu: 0.0.40
codegen_flags: <defaults>
</compile_context>

<pallas_src>
import math

import jax
import jax.numpy as jnp
from jax.experimental import pallas as pl
from jax.experimental.pallas import tpu as pltpu


def _cdiv(a, b):
    return -(-a // b)


# ----------------------------- kernels ------------------------------------- #

def _kernel_no_z(x_ref, w_ref, b_ref, o_ref):
    # x:(TM,IN)  w:(IN,TN)  b:(1,TN)  o:(TM,TN)
    y = jnp.dot(x_ref[...], w_ref[...], preferred_element_type=jnp.float32)
    o_ref[...] = jnp.sin(y + b_ref[...]).astype(o_ref.dtype)


def _kernel_scalar_z(x_ref, w_ref, b_ref, z_ref, o_ref):
    # z_ref: (1,) float32 scalar living in SMEM.
    y = jnp.dot(x_ref[...], w_ref[...], preferred_element_type=jnp.float32)
    o_ref[...] = jnp.sin(z_ref[0] * (y + b_ref[...])).astype(o_ref.dtype)


def _kernel_tensor_z(x_ref, w_ref, b_ref, z_ref, o_ref):
    # z:(TM,TN) float32
    y = jnp.dot(x_ref[...], w_ref[...], preferred_element_type=jnp.float32)
    o_ref[...] = jnp.sin(z_ref[...] * (y + b_ref[...])).astype(o_ref.dtype)


# ----------------------------- tiling helpers ------------------------------- #

def _pick_tile_m(batch, sublane):
    # Big batches: 512-row tiles (fewer grid steps, still tiny VMEM since in_f
    # is usually small for FourierNet).  Small batches: round up to the sublane
    # multiple so there is a single grid step instead of many tiny ones.
    if batch >= 512:
        return 512
    if batch >= 256:
        return 256
    return max(sublane, _cdiv(batch, sublane) * sublane)


def _pick_tile_n(out_f):
    # Largest lane-dense tile that divides out_features; fall back to the full
    # dim (always a legal block shape) when out_f is not 128-aligned.
    for t in (512, 256, 128):
        if out_f % t == 0:
            return t
    return out_f


def _vmem_limit_bytes(tile_m, in_f, tile_n, mxu_bytes, has_z_tensor):
    per_step = (tile_m * in_f * mxu_bytes        # x block
                + in_f * tile_n * mxu_bytes      # weight block
                + tile_n * 4                     # bias row
                + tile_m * tile_n * 4)           # output block
    if has_z_tensor:
        per_step += tile_m * tile_n * 4
    est = 2 * per_step + (4 << 20)               # double-buffering + headroom
    # Stay >= the 32 MiB scoped default, never exceed v7x's 64 MiB physical VMEM.
    return int(max(32 << 20, min(est, 56 << 20)))


# ----------------------------- public wrapper ------------------------------- #

def fourier_layer(x, weight_t, bias, z=None, *, compute_dtype=None):
    """Pallas implementation of FourierLayer.forward.

    x:        (..., in_features)
    weight_t: (in_features, out_features)  -- PyTorch (out,in) weight transposed
                                              ONCE at parameter-load time.
    bias:     (out_features,)
    z:        None, a scalar, or broadcastable to (..., out_features)
    compute_dtype: None (keep x dtype) or jnp.bfloat16 to feed the MXU in bf16
                   (accumulation, bias add and sin stay in float32).
    """
    in_f_w, out_f = weight_t.shape
    lead_shape = x.shape[:-1]
    in_f = x.shape[-1]
    assert in_f == in_f_w, "weight_t must be (in_features, out_features)"
    out_dtype = x.dtype

    # Flatten leading dims like nn.Linear.
    B = 1
    for d in lead_shape:
        B *= int(d)
    x2d = x.reshape(B, in_f)

    mxu_dtype = x.dtype if compute_dtype is None else compute_dtype
    x_c = x2d.astype(mxu_dtype)
    w_c = weight_t.astype(mxu_dtype)
    b2d = bias.reshape(1, out_f).astype(jnp.float32)

    sublane = 16 if mxu_dtype == jnp.bfloat16 else 8
    tile_m = _pick_tile_m(B, sublane)
    tile_n = _pick_tile_n(out_f)
    b_pad = _cdiv(B, tile_m) * tile_m
    if b_pad != B:
        x_c = jnp.pad(x_c, ((0, b_pad - B), (0, 0)))

    # Weight axis (j) outermost: the weight block is re-fetched only when j
    # changes, not once per batch tile.
    grid = (out_f // tile_n, b_pad // tile_m)

    x_spec = pl.BlockSpec((tile_m, in_f), lambda j, i: (i, 0))
    w_spec = pl.BlockSpec((in_f, tile_n), lambda j, i: (0, j))
    b_spec = pl.BlockSpec((1, tile_n), lambda j, i: (0, j))
    o_spec = pl.BlockSpec((tile_m, tile_n), lambda j, i: (i, j))

    # Classify z: missing / scalar / full tensor.
    z_mode = "none"
    z_scalar = None
    z_full = None
    if z is not None:
        z_arr = jnp.asarray(z, jnp.float32)
        if z_arr.size == 1:
            z_mode = "scalar"
            z_scalar = z_arr.reshape((1,))
        else:
            z_mode = "tensor"
            z_full = jnp.broadcast_to(z_arr, lead_shape + (out_f,))
            z_full = z_full.reshape(B, out_f).astype(jnp.float32)
            if b_pad != B:
                z_full = jnp.pad(z_full, ((0, b_pad - B), (0, 0)))

    mxu_bytes = jnp.dtype(mxu_dtype).itemsize
    cparams = pltpu.CompilerParams(
        dimension_semantics=("parallel", "parallel"),
        vmem_limit_bytes=_vmem_limit_bytes(
            tile_m, in_f, tile_n, mxu_bytes, z_mode == "tensor"),
    )
    out_shape = jax.ShapeDtypeStruct((b_pad, out_f), out_dtype)

    if z_mode == "none":
        out = pl.pallas_call(
            _kernel_no_z,
            out_shape=out_shape,
            grid_spec=pltpu.PrefetchScalarGridSpec(
                num_scalar_prefetch=0,
                grid=grid,
                in_specs=[x_spec, w_spec, b_spec],
                out_specs=o_spec),
            compiler_params=cparams,
        )(x_c, w_c, b2d)
    elif z_mode == "scalar":
        z_spec = pl.BlockSpec(memory_space=pltpu.MemorySpace.SMEM)
        out = pl.pallas_call(
            _kernel_scalar_z,
            out_shape=out_shape,
            grid_spec=pltpu.PrefetchScalarGridSpec(
                num_scalar_prefetch=0,
                grid=grid,
                in_specs=[x_spec, w_spec, b_spec, z_spec],
                out_specs=o_spec),
            compiler_params=cparams,
        )(x_c, w_c, b2d, z_scalar)
    else:  # full (B, out_f) z tensor
        z_spec = pl.BlockSpec((tile_m, tile_n), lambda j, i: (i, j))
        out = pl.pallas_call(
            _kernel_tensor_z,
            out_shape=out_shape,
            grid_spec=pltpu.PrefetchScalarGridSpec(
                num_scalar_prefetch=0,
                grid=grid,
                in_specs=[x_spec, w_spec, b_spec, z_spec],
                out_specs=o_spec),
            compiler_params=cparams,
        )(x_c, w_c, b2d, z_full)

    out = out[:B] if b_pad != B else out
    return out.reshape(lead_shape + (out_f,))


# ----------------------------- init (parity with nn.Module) ----------------- #

def init_fourier_layer_params(key, in_features, out_features, weight_scale):
    """Mirrors FourierLayer.__init__ shapes/distributions.

    Weights are stored pre-transposed (in_features, out_features) so the
    forward path never performs an XLA transpose.
    """
    k1, k2, k3, k4 = jax.random.split(key, 4)
    bound = 1.0 / math.sqrt(in_features)          # PyTorch Linear default init
    linear_w_t = (jax.random.uniform(k1, (out_features, in_features),
                                     minval=-bound, maxval=bound) * weight_scale).T
    linear_b = jax.random.uniform(k2, (out_features,),
                                  minval=-math.pi, maxval=math.pi)
    # `spatial` Linear is created in __init__ but never used in forward().
    spatial_w_t = (jax.random.uniform(k3, (out_features, in_features),
                                      minval=-bound, maxval=bound) * weight_scale).T
    spatial_b = jax.random.uniform(k4, (out_features,),
                                   minval=-math.pi, maxval=math.pi)
    return dict(linear_w_t=linear_w_t, linear_b=linear_b,
                spatial_w_t=spatial_w_t, spatial_b=spatial_b)


# ----------------------------- demo / self-check ---------------------------- #

if __name__ == "__main__":
    key = jax.random.PRNGKey(0)
    kx, kz, kp = jax.random.split(key, 3)

    B, in_features, out_features = 16, 32, 128
    weight_scale = 30.0

    params = init_fourier_layer_params(kp, in_features, out_features, weight_scale)
    w_t, b = params["linear_w_t"], params["linear_b"]

    x = jax.random.normal(kx, (B, in_features), dtype=jnp.float32)
    z = jax.random.normal(kz, (B, out_features), dtype=jnp.float32)

    ref_y = x @ w_t + b

    # 1) z = None     -> sin(linear(x))       (specialized kernel, no fake z traffic)
    out1 = fourier_layer(x, w_t, b, z=None)
    # 2) scalar z     -> sin(z * linear(x))   (z passed via SMEM, no (B,out) broadcast)
    out2 = fourier_layer(x, w_t, b, z=2.5)
    # 3) tensor z     -> sin(z * linear(x))
    out3 = fourier_layer(x, w_t, b, z=z)
    # 4) ragged batch -> exercises cdiv grid + batch padding (B=13, not a tile multiple)
    out4 = fourier_layer(x[:13], w_t, b, z=None)
    # 5) leading batch dims like nn.Linear: (2, 8, in_features)
    out5 = fourier_layer(x.reshape(2, 8, in_features), w_t, b, z=None)
    # 6) bf16 MXU path (v6e/v7x recommendation); bias add and sin stay in f32.
    out6 = fourier_layer(x, w_t, b, z=None, compute_dtype=jnp.bfloat16)
    jax.block_until_ready((out1, out2, out3, out4, out5, out6))

    assert jnp.allclose(out1, jnp.sin(ref_y), atol=1e-4, rtol=1e-4)
    assert jnp.allclose(out2, jnp.sin(2.5 * ref_y), atol=1e-4, rtol=1e-4)
    assert jnp.allclose(out3, jnp.sin(z * ref_y), atol=1e-4, rtol=1e-4)
    assert out4.shape == (13, out_features)
    assert jnp.allclose(out4, jnp.sin(ref_y[:13]), atol=1e-4, rtol=1e-4)
    assert out5.shape == (2, 8, out_features)
    assert jnp.allclose(out5.reshape(B, out_features), jnp.sin(ref_y),
                        atol=1e-4, rtol=1e-4)
    # bf16 check is intentionally loose: with weight_scale=30 the pre-sin
    # activations are O(50), so bf16 rounding of y legitimately moves sin(y)
    # by a large amount; only shape and finiteness are sanity-checked here.
    assert out6.shape == (B, out_features) and bool(jnp.all(jnp.isfinite(out6)))

    print("KERNEL_OK")
</pallas_src>

<mosaic_0001>
module attributes {stable_mosaic.version = 11 : i64} {
  func.func @_kernel_no_z(%arg0: i32, %arg1: i32, %arg2: memref<16x32xf32, #tpu.memory_space<vmem>>, %arg3: memref<32x128xf32, #tpu.memory_space<vmem>>, %arg4: memref<1x128xf32, #tpu.memory_space<vmem>>, %arg5: memref<16x128xf32, #tpu.memory_space<vmem>>) attributes {dimension_semantics = [#tpu.dimension_semantics<parallel>, #tpu.dimension_semantics<parallel>], iteration_bounds = array<i64: 1, 1>, scalar_prefetch = 0 : i64, scratch_operands = 0 : i64, tpu.core_type = #tpu.core_type<tc>, window_params = [{transform_indices = @transform_0, window_bounds = array<i64: 16, 32>}, {transform_indices = @transform_1, window_bounds = array<i64: 32, 128>}, {transform_indices = @transform_2, window_bounds = array<i64: 1, 128>}, {transform_indices = @transform_3, window_bounds = array<i64: 16, 128>}]} {
    %c0 = arith.constant 0 : index
    %c0_0 = arith.constant 0 : index
    %0 = vector.load %arg2[%c0, %c0_0] : memref<16x32xf32, #tpu.memory_space<vmem>>, vector<16x32xf32>
    %c0_1 = arith.constant 0 : index
    %c0_2 = arith.constant 0 : index
    %1 = vector.load %arg3[%c0_1, %c0_2] : memref<32x128xf32, #tpu.memory_space<vmem>>, vector<32x128xf32>
    %cst = arith.constant dense<0.000000e+00> : vector<16x128xf32>
    %2 = tpu.matmul %0, %1, %cst {dimension_numbers = #tpu.dot_dimension_numbers<[1], [0], [0], [1], [0, 0, 1, 1], [], []>} : vector<16x32xf32>, vector<32x128xf32>, vector<16x128xf32> -> vector<16x128xf32>
    %c0_3 = arith.constant 0 : index
    %c0_4 = arith.constant 0 : index
    %3 = vector.load %arg4[%c0_3, %c0_4] : memref<1x128xf32, #tpu.memory_space<vmem>>, vector<1x128xf32>
    %4 = vector.broadcast %3 : vector<1x128xf32> to vector<16x128xf32>
    %5 = arith.addf %2, %4 : vector<16x128xf32>
    %6 = math.sin %5 : vector<16x128xf32>
    %c0_5 = arith.constant 0 : index
    %c0_6 = arith.constant 0 : index
    %7 = vector.load %arg5[%c0_5, %c0_6] : memref<16x128xf32, #tpu.memory_space<vmem>>, vector<16x128xf32>
    tpu.vector_store %arg5[%c0_5, %c0_6], %6 {strides = array<i32>} : memref<16x128xf32, #tpu.memory_space<vmem>>, vector<16x128xf32>,
    return
  }
  func.func @transform_0(%arg0: i32, %arg1: i32) -> (i32, i32) {
    %c0_i32 = arith.constant 0 : i32
    %c0_i32_0 = arith.constant 0 : i32
    return %arg1, %c0_i32 : i32, i32
  }
  func.func @transform_1(%arg0: i32, %arg1: i32) -> (i32, i32) {
    %c0_i32 = arith.constant 0 : i32
    %c0_i32_0 = arith.constant 0 : i32
    return %c0_i32, %arg0 : i32, i32
  }
  func.func @transform_2(%arg0: i32, %arg1: i32) -> (i32, i32) {
    %c0_i32 = arith.constant 0 : i32
    %c0_i32_0 = arith.constant 0 : i32
    return %c0_i32, %arg0 : i32, i32
  }
  func.func @transform_3(%arg0: i32, %arg1: i32) -> (i32, i32) {
    %c0_i32 = arith.constant 0 : i32
    return %arg1, %arg0 : i32, i32
  }
}

</mosaic_0001>

<bundles_post_ra>
// kernel: tpu_custom_call.1
= control target key start
LH: loop header
LB: loop body
LE: loop exit
PB: predicated region body
PF: predicated region fallthrough
CT: control target
= control target key end

     0   :  { %8 = vsyncpa [#allocation3], 0  ;;  %s610_s0 = inlined_call_operand.hbm [shape: f32[16,32], index: 0, kind: input, shape index: {}]   ;;  %s611_s1 = inlined_call_operand.hbm [shape: f32[32,128], index: 1, kind: input, shape index: {}]   ;;  %s612_s2 = inlined_call_operand.vmem [shape: f32[1,128], index: 2, kind: input, shape index: {}]   ;;  %s613_s3 = inlined_call_operand.hbm [shape: f32[16,128], index: 3, kind: output, shape index: {}]  }
   0x1   :  { %9 = vsyncpa [#allocation6], 0 }
   0x2   :  { %10 = vsyncpa [#allocation4], 0  ;;  %s487_s12 = smov [#allocation2]  }
   0x3   :  { %s16_s13 = sshll.u32 %s487_s12, 4  ;;  %s17_s13 = int_to_ptr.vmem [resolvable:$true] %s16_s13 }
   0x4   :  { %s429_s14 = scalar_lea.vmem %s17_s13, 256  ;;  %p434_p1 = scmp.lt.s32.totalorder %s17_s13, %s17_s13 }
   0x5   :  { %p430_p0 = scmp.ne.s32.totalorder %s17_s13, %s429_s14  ;;  %p435_p2 = scmp.lt.s32.totalorder %s429_s14, %s429_s14 }
   0x7   :  { %p436_p3 = por %p435_p2, %p434_p1 }
   0x9   :  { %p437_p4 = pnand %p436_p3, %p430_p0 }
   0xb   :  { %440 = shalt.err (!%p437_p4)
}
   0xc   :  { %s488_s15 = smov 128   ;;  %s489_s16 = smov 8  }
   0xd   :  { %22 = dma.hbm_to_vmem [thread:$0]  %s610_s0, 256, %s17_s13, [#allocation3], %s488_s15, %s488_s15, %s489_s16  }
   0xe   :  { %s490_s19 = smov [#allocation5]  }
   0xf   :  { %s28_s20 = sshll.u32 %s490_s19, 4  ;;  %s29_s20 = int_to_ptr.vmem [resolvable:$true] %s28_s20 }
  0x10   :  { %s449_s21 = scalar_lea.vmem %s29_s20, 512  ;;  %p454_p6 = scmp.lt.s32.totalorder %s29_s20, %s29_s20 }
  0x11   :  { %p450_p5 = scmp.ne.s32.totalorder %s29_s20, %s449_s21  ;;  %p455_p7 = scmp.lt.s32.totalorder %s449_s21, %s449_s21 }
  0x13   :  { %p456_p8 = por %p455_p7, %p454_p6 }
  0x15   :  { %p457_p9 = pnand %p456_p8, %p450_p5 }
  0x17   :  { %460 = shalt.err (!%p457_p9)
}
  0x18   :  { %34 = dma.hbm_to_vmem [thread:$0]  %s611_s1, 512, %s29_s20, [#allocation6], %s488_s15, %s488_s15, %s489_s16  }
  0x19   :  { %481 = dma.done.wait [#allocation3], 256  }
  0x1a   :  { %482 = vsyncadd [#allocation3], 4294967040 }
  0x1b   :  { %483 = dma.done.wait [#allocation6], 512  }
  0x1c   :  { %484 = vsyncadd [#allocation6], 4294966784  ;;  %vm56_vm0 = vcmask 261120   ;;  %v48_v0 = vld [vmem:[#allocation5 + $0x18] sm:$0xff]  ;;  %v47_v1 = vld [vmem:[#allocation5 + $0x10] sm:$0xff] }
  0x1d   :  { %383 = vmatprep.subr.mxu0 %v48_v0  ;;  %v43_v2 = vld [vmem:[#allocation2] sm:$0xff]  ;;  %v46_v3 = vld [vmem:[#allocation5 + $0x8] sm:$0xff]  ;;  %v45_v4 = vld [vmem:[#allocation5] sm:$0xff]  ;;  %v491_v29 = vmov 683565275  }
  0x1e   :  { %384 = vmatpush3.msra.mxu0 %v48_v0  ;;  %391 = vmatprep.mubr.msk.f32.mxu0 %vm56_vm0, %v43_v2  ;;  %v44_v5 = vld [vmem:[#allocation2 + $0x8] sm:$0xff]  ;;  %v366_v6 = vld [vmem:[%s612_s2] ss:$0 sm:$0xff]  ;;  %v492_v32 = vmov 2475754826   ;;  %s497_s2 = smov [#allocation7]  }
  0x1f   :  { %385 = vmatprep.subr.mxu0 %v47_v1  ;;  %v493_v34 = vmov 2131351028   ;;  %v494_v36 = vmov 2102212464   ;;  %v495_v38 = vmov 920167782  }
  0x20   :  { %386 = vmatpush3.msra.mxu0 %v47_v1  ;;  %v496_v45 = vmov 1326507024   ;;  %s353_s24 = sshll.u32 %s497_s2, 4  ;;  %s354_s24 = int_to_ptr.vmem [resolvable:$true] %s353_s24 }
  0x21   :  { %387 = vmatprep.subr.mxu0 %v46_v3  ;;  %s461_s25 = scalar_lea.vmem %s354_s24, 256  ;;  %p466_p11 = scmp.lt.s32.totalorder %s354_s24, %s354_s24 }
  0x22   :  { %388 = vmatpush3.msra.mxu0 %v46_v3  ;;  %p462_p10 = scmp.ne.s32.totalorder %s354_s24, %s461_s25  ;;  %p467_p12 = scmp.lt.s32.totalorder %s461_s25, %s461_s25 }
  0x23   :  { %389 = vmatprep.subr.mxu0 %v45_v4 }
  0x24   :  { %390 = vmatpush3.msra.mxu0 %v45_v4  ;;  %p468_p13 = por %p467_p12, %p466_p11 }
  0x25   :  { %392 = vmatmul.mubr.msk.f32.vlgmr.msra.gmra.mxu0 %vm56_vm0, %v44_v5 }
  0x26   :  { %p469_p0 = pnand %p468_p13, %p462_p10 }
  0xe5   :  { %v393_v7 = vpop.f32.mrf.mxu0 }
  0xe6   :  { %v535_v8 = vadd.f32 %v393_v7, %v366_v6 }
  0xe7   :  { %v129_v9 = vpop.f32.mrf.mxu0 }
  0xe8   :  { %v242_v10 = vand.u32 2147483647, %v535_v8  ;;  %v245_v11 = vand.u32 2139095040, %v535_v8  ;;  %v539_v12 = vadd.f32 %v366_v6, %v129_v9  ;;  %vm244_vm15 = vcmp.lt.s32.totalorder %v535_v8, 0 }
  0xea   :  { %v246_v13 = vshrl.u32 %v245_v11, 23  ;;  %v249_v14 = vand.u32 8388607, %v242_v10  ;;  %v141_v15 = vand.u32 2139095040, %v539_v12  ;;  %v138_v17 = vand.u32 2147483647, %v539_v12 }
  0xeb   :  { %vm589_vm0 = vcmp.le.f32.partialorder %v242_v10, 0.7853982 }
  0xec   :  { %v373_v16 = vadd.s32 4294967169, %v246_v13  ;;  %v142_v18 = vshrl.u32 %v141_v15, 23  ;;  %v250_v20 = vor.u32 8388608, %v249_v14  ;;  %v145_v22 = vand.u32 8388607, %v138_v17 }
  0xee   :  { %v252_v19 = vadd.s32 1, %v373_v16  ;;  %v369_v21 = vadd.s32 4294967169, %v142_v18  ;;  %v547_v27 = vshll.u32 %v250_v20, 8  ;;  %v146_v31 = vor.u32 8388608, %v145_v22 }
  0xf0   :  { %vm253_vm1 = vcmp.gt.s32.totalorder %v252_v19, 0  ;;  %v148_v24 = vadd.s32 1, %v369_v21  ;;  %v186_v0 = vshll.u32 %v146_v31, 8 }
  0xf1   :  { %v254_v23 = vsel %vm253_vm1, %v252_v19, 0  ;;  %vm140_vm1 = vcmp.lt.s32.totalorder %v539_v12, 0 }
  0xf2   :  { %v255_v25 = vshrl.u32 %v254_v23, 5  ;;  %v256_v26 = vand.u32 31, %v254_v23  ;;  %vm149_vm2 = vcmp.gt.s32.totalorder %v148_v24, 0 }
  0xf3   :  { %v150_v50 = vsel %vm149_vm2, %v148_v24, 0  ;;  %vm139_vm2 = vcmp.le.f32.partialorder %v138_v17, 0.7853982 }
  0xf4   :  { %v257_v28 = vsub.s32 32, %v256_v26  ;;  %v259_v30 = vshll.u32 %v491_v29, %v256_v26  ;;  %v262_v33 = vshll.u32 %v492_v32, %v256_v26  ;;  %v265_v35 = vshll.u32 %v493_v34, %v256_v26 }
  0xf5   :  { %v268_v37 = vshll.u32 %v494_v36, %v256_v26  ;;  %v271_v39 = vshll.u32 %v495_v38, %v256_v26  ;;  %vm274_vm3 = vcmp.lt.s32.totalorder %v255_v25, 1  ;;  %vm276_vm4 = vcmp.lt.s32.totalorder %v255_v25, 3 }
  0xf6   :  { %v260_v40 = vshrl.u32 %v492_v32, %v257_v28  ;;  %v263_v41 = vshrl.u32 %v493_v34, %v257_v28  ;;  %v266_v42 = vshrl.u32 %v494_v36, %v257_v28  ;;  %v258_v43 = vshrl.u32 %v491_v29, %v257_v28 }
  0xf7   :  { %v269_v44 = vshrl.u32 %v495_v38, %v257_v28  ;;  %v272_v46 = vshrl.u32 %v496_v45, %v257_v28  ;;  %vm277_vm5 = vcmp.lt.s32.totalorder %v255_v25, 4  ;;  %v152_v53 = vand.u32 31, %v150_v50 }
  0xf8   :  { %v261_v47 = vor.u32 %v260_v40, %v259_v30  ;;  %v264_v48 = vor.u32 %v263_v41, %v262_v33  ;;  %v267_v49 = vor.u32 %v266_v42, %v265_v35  ;;  %vm275_vm6 = vcmp.lt.s32.totalorder %v255_v25, 2 }
  0xf9   :  { %v270_v51 = vor.u32 %v269_v44, %v268_v37  ;;  %v273_v52 = vor.u32 %v272_v46, %v271_v39  ;;  %v153_v61 = vsub.s32 32, %v152_v53  ;;  %v151_v4 = vshrl.u32 %v150_v50, 5 }
  0xfa   :  { %v278_v54 = vsel %vm274_vm3, %v258_v43, %v261_v47  ;;  %v279_v55 = vsel %vm277_vm5, %v267_v49, 2102212464  ;;  %v282_v56 = vsel %vm274_vm3, %v261_v47, %v264_v48  ;;  %v286_v57 = vsel %vm274_vm3, %v264_v48, %v267_v49 }
  0xfb   :  { %v280_v58 = vsel %vm276_vm4, %v264_v48, %v279_v55  ;;  %v283_v59 = vsel %vm277_vm5, %v270_v51, 920167782  ;;  %v287_v60 = vsel %vm277_vm5, %v273_v52, 1326507024  ;;  %v155_v11 = vshll.u32 %v491_v29, %v152_v53 }
  0xfc   :  { %v284_v62 = vsel %vm276_vm4, %v267_v49, %v283_v59  ;;  %v288_v63 = vsel %vm276_vm4, %v270_v51, %v287_v60  ;;  %v281_v1 = vsel %vm275_vm6, %v278_v54, %v280_v58  ;;  %v156_v13 = vshrl.u32 %v492_v32, %v153_v61 }
  0xfd   :  { %v285_v2 = vsel %vm275_vm6, %v282_v56, %v284_v62  ;;  %v289_v3 = vsel %vm275_vm6, %v286_v57, %v288_v63  ;;  %v158_v14 = vshll.u32 %v492_v32, %v152_v53  ;;  %v159_v15 = vshrl.u32 %v493_v34, %v153_v61 }
  0xfe   :  { %v559_v5 = vmul.u32.u64.low %v547_v27, %v289_v3  ;;  %v560_v6 = vmul.u32.u64.high %v547_v27, %v289_v3, %v559_v5  ;;  %v563_v7 = vmul.u32.u64.low %v547_v27, %v285_v2  ;;  %v564_v9 = vmul.u32.u64.high %v547_v27, %v285_v2, %v563_v7 }
  0xff   :  { %v161_v16 = vshll.u32 %v493_v34, %v152_v53  ;;  %v162_v18 = vshrl.u32 %v494_v36, %v153_v61  ;;  %v164_v19 = vshll.u32 %v494_v36, %v152_v53  ;;  %v165_v20 = vshrl.u32 %v495_v38, %v153_v61 }
 0x100   :  { %v157_v21 = vor.u32 %v156_v13, %v155_v11  ;;  %v160_v22 = vor.u32 %v159_v15, %v158_v14  ;;  %v167_v23 = vshll.u32 %v495_v38, %v152_v53  ;;  %v168_v24 = vshrl.u32 %v496_v45, %v153_v61 }
 0x101   :  { %v297_v25 = vmul.u32 %v547_v27, %v281_v1  ;;  %vm299_vm7 = vc.u32 %v560_v6, %v563_v7  ;;  %v300_v26 = vadd.s32 1, %v564_v9  ;;  %v163_v28 = vor.u32 %v162_v18, %v161_v16 }
 0x102   :  { %v154_v30 = vshrl.u32 %v491_v29, %v153_v61  ;;  %v166_v31 = vor.u32 %v165_v20, %v164_v19  ;;  %v169_v32 = vor.u32 %v168_v24, %v167_v23  ;;  %vm170_vm8 = vcmp.lt.s32.totalorder %v151_v4, 1 }
 0x103   :  { %v301_v33 = vsel %vm299_vm7, %v300_v26, %v564_v9  ;;  %vm172_vm9 = vcmp.lt.s32.totalorder %v151_v4, 3  ;;  %vm173_vm10 = vcmp.lt.s32.totalorder %v151_v4, 4  ;;  %v178_v34 = vsel %vm170_vm8, %v157_v21, %v160_v22 }
 0x104   :  { %v302_v35 = vadd.s32 %v301_v33, %v297_v25  ;;  %v175_v36 = vsel %vm173_vm10, %v163_v28, 2102212464  ;;  %v179_v37 = vsel %vm173_vm10, %v166_v31, 920167782  ;;  %v182_v27 = vsel %vm170_vm8, %v160_v22, %v163_v28 }
 0x105   :  { %vm171_vm11 = vcmp.lt.s32.totalorder %v151_v4, 2  ;;  %v174_v38 = vsel %vm170_vm8, %v154_v30, %v157_v21  ;;  %v180_v39 = vsel %vm172_vm9, %v163_v28, %v179_v37  ;;  %v183_v40 = vsel %vm173_vm10, %v169_v32, 1326507024 }
 0x106   :  { %v303_v41 = vadd.s32 536870912, %v302_v35  ;;  %v176_v42 = vsel %vm172_vm9, %v160_v22, %v175_v36  ;;  %v181_v43 = vsel %vm171_vm11, %v178_v34, %v180_v39  ;;  %v184_v29 = vsel %vm172_vm9, %v166_v31, %v183_v40 }
 0x107   :  { %v185_v44 = vsel %vm171_vm11, %v182_v27, %v184_v29  ;;  %v574_v45 = vmul.u32.u64.low %v186_v0, %v181_v43  ;;  %v575_v46 = vmul.u32.u64.high %v186_v0, %v181_v43, %v574_v45  ;;  %v177_v50 = vsel %vm171_vm11, %v174_v38, %v176_v42 }
 0x108   :  { %v304_v47 = vshrl.u32 %v303_v41, 30  ;;  %v577_v48 = vmul.u32.u64.low %v186_v0, %v185_v44  ;;  %v578_v49 = vmul.u32.u64.high %v186_v0, %v185_v44, %v577_v48  ;;  %v193_v54 = vmul.u32 %v186_v0, %v177_v50 }
 0x109   :  { %v196_v52 = vadd.s32 1, %v575_v46  ;;  %v298_v3 = vadd.s32 %v563_v7, %v560_v6  ;;  %vm334_vm6 = vweird.f32 %v535_v8  ;;  %vm230_vm10 = vweird.f32 %v539_v12 }
 0x10a   :  { %v305_v51 = vshll.u32 %v304_v47, 30  ;;  %vm195_vm12 = vc.u32 %v578_v49, %v574_v45  ;;  %v194_v25 = vadd.s32 %v574_v45, %v578_v49  ;;  %v328_v32 = vsub.s32 4, %v304_v47 }
 0x10b   :  { %v197_v55 = vsel %vm195_vm12, %v196_v52, %v575_v46 }
 0x10c   :  { %v306_v53 = vsub.s32 %v302_v35, %v305_v51  ;;  %v198_v57 = vadd.s32 %v197_v55, %v193_v54  ;;  %v329_v38 = vsel %vm244_vm15, %v328_v32, %v304_v47 }
 0x10d   :  { %v331_v10 = vsel %vm589_vm0, 0, %v329_v38 }
 0x10e   :  { %v308_v56 = vsub.s32 0, %v306_v53  ;;  %v199_v59 = vadd.s32 536870912, %v198_v57  ;;  %v335_v29 = vadd.s32 3, %v331_v10 }
 0x110   :  { %v374_v58 = vmin.u32 %v308_v56, %v306_v53  ;;  %v200_v61 = vshrl.u32 %v199_v59, 30  ;;  %v336_v47 = vand.u32 3, %v335_v29 }
 0x112   :  { %v310_v60 = vclz %v374_v58  ;;  %v201_v63 = vshll.u32 %v200_v61, 30  ;;  %v224_v43 = vsub.s32 4, %v200_v61  ;;  %vm341_vm3 = vcmp.eq.s32.totalorder %v336_v47, 2 }
 0x113   :  { %vm338_vm4 = vcmp.eq.s32.totalorder %v336_v47, 0  ;;  %vm337_vm5 = vcmp.lt.s32.totalorder %v336_v47, 2 }
 0x114   :  { %v375_v62 = vadd.s32 4294967294, %v310_v60  ;;  %v202_v1 = vsub.s32 %v198_v57, %v201_v63  ;;  %v225_v46 = vsel %vm140_vm1, %v224_v43, %v200_v61 }
 0x115   :  { %v227_v50 = vsel %vm139_vm2, 0, %v225_v46 }
 0x116   :  { %vm376_vm13 = vcmp.lt.s32.totalorder %v375_v62, 0  ;;  %v204_v5 = vsub.s32 0, %v202_v1  ;;  %v231_v54 = vadd.s32 3, %v227_v50 }
 0x117   :  { %v313_v2 = vsel %vm376_vm13, 0, %v375_v62 }
 0x118   :  { %v314_v4 = vsub.s32 32, %v313_v2  ;;  %v318_v0 = vsub.s32 4294967266, %v313_v2  ;;  %v315_v9 = vshll.u32 %v306_v53, %v313_v2  ;;  %v370_v14 = vmin.u32 %v204_v5, %v202_v1 }
 0x119   :  { %v232_v57 = vand.u32 3, %v231_v54 }
 0x11a   :  { %v316_v11 = vshrl.u32 %v298_v3, %v314_v4  ;;  %v319_v13 = vadd.s32 127, %v318_v0  ;;  %v206_v18 = vclz %v370_v14 }
 0x11b   :  { %vm237_vm7 = vcmp.eq.s32.totalorder %v232_v57, 2  ;;  %vm234_vm8 = vcmp.eq.s32.totalorder %v232_v57, 0  ;;  %vm233_vm9 = vcmp.lt.s32.totalorder %v232_v57, 2 }
 0x11c   :  { %v317_v15 = vor.u32 %v316_v11, %v315_v9  ;;  %v320_v16 = vshll.u32 %v319_v13, 23  ;;  %v371_v20 = vadd.s32 4294967294, %v206_v18 }
 0x11e   :  { %v321_v19 = vor.u32 4788187, %v320_v16  ;;  %v324_v22 = vcvt.s32.f32 %v317_v15  ;;  %vm372_vm14 = vcmp.lt.s32.totalorder %v371_v20, 0 }
 0x11f   :  { %v209_v23 = vsel %vm372_vm14, 0, %v371_v20 }
 0x120   :  { %v322_v21 = vand.u32 2147483647, %v321_v19  ;;  %v210_v6 = vsub.s32 32, %v209_v23  ;;  %v214_v7 = vsub.s32 4294967266, %v209_v23  ;;  %v211_v28 = vshll.u32 %v202_v1, %v209_v23 }
 0x122   :  { %v325_v24 = vmul.f32 %v324_v22, %v322_v21  ;;  %v212_v30 = vshrl.u32 %v194_v25, %v210_v6  ;;  %v215_v31 = vadd.s32 127, %v214_v7 }
 0x124   :  { %v326_v26 = vxor.u32 2147483648, %v325_v24  ;;  %v213_v35 = vor.u32 %v212_v30, %v211_v28  ;;  %v216_v36 = vshll.u32 %v215_v31, 23 }
 0x126   :  { %v327_v34 = vsel %vm244_vm15, %v326_v26, %v325_v24  ;;  %v217_v27 = vor.u32 4788187, %v216_v36  ;;  %v220_v40 = vcvt.s32.f32 %v213_v35 }
 0x127   :  { %v330_v37 = vsel %vm589_vm0, %v535_v8, %v327_v34 }
 0x128   :  { %413 = vcosq.f32 %v330_v37  ;;  %v218_v39 = vand.u32 2147483647, %v217_v27 }
 0x129   :  { %415 = vsinq.f32 %v330_v37 }
 0x12a   :  { %v221_v41 = vmul.f32 %v220_v40, %v218_v39 }
 0x12c   :  { %v222_v42 = vxor.u32 2147483648, %v221_v41 }
 0x12e   :  { %v223_v44 = vsel %vm140_vm1, %v222_v42, %v221_v41 }
 0x12f   :  { %v226_v45 = vsel %vm139_vm2, %v539_v12, %v223_v44 }
 0x130   :  { %417 = vcosq.f32 %v226_v45 }
 0x131   :  { %419 = vsinq.f32 %v226_v45 }
 0x135   :  { %v414_v48 = vpop.eup %413 }
 0x136   :  { %v416_v49 = vpop.eup %415  ;;  %v342_v51 = vxor.u32 2147483648, %v414_v48 }
 0x137   :  { %v339_v52 = vxor.u32 2147483648, %v416_v49 }
 0x138   :  { %v343_v53 = vsel %vm341_vm3, %v342_v51, %v416_v49 }
 0x139   :  { %v340_v55 = vsel %vm338_vm4, %v414_v48, %v339_v52 }
 0x13a   :  { %v344_v17 = vsel %vm337_vm5, %v340_v55, %v343_v53 }
 0x13b   :  { %v345_v56 = vsel %vm334_vm6, nan, %v344_v17 }
 0x13c   :  { %347 = vst [vmem:[#allocation7 + $0x8] sm:$0xff] %v345_v56 }
 0x13d   :  { %v418_v58 = vpop.eup %417 }
 0x13e   :  { %v420_v59 = vpop.eup %419  ;;  %v238_v60 = vxor.u32 2147483648, %v418_v58 }
 0x13f   :  { %v235_v61 = vxor.u32 2147483648, %v420_v59 }
 0x140   :  { %v239_v62 = vsel %vm237_vm7, %v238_v60, %v420_v59 }
 0x141   :  { %v236_v63 = vsel %vm234_vm8, %v418_v58, %v235_v61 }
 0x142   :  { %v240_v1 = vsel %vm233_vm9, %v236_v63, %v239_v62 }
 0x143   :  { %v241_v8 = vsel %vm230_vm10, nan, %v240_v1 }
 0x144   :  { %346 = vst [vmem:[#allocation7] sm:$0xff] %v241_v8 }
 0x145   :  { %472 = shalt.err (!%p469_p0)
}
 0x146   :  { %359 = dma.vmem_to_hbm [thread:$0]  %s354_s24, 256, %s613_s3, [#allocation4], %s488_s15, %s488_s15, %s489_s16  }
 0x147   :  { %485 = dma.done.wait [#allocation4], 256  }
 0x148   :  { %486 = vsyncadd [#allocation4], 4294967040 }
 0x149   :  { %363 = vsyncpa [#allocation3], 1 }
 0x14a   :  { %364 = vsyncpa [#allocation6], 1 }
 0x14b   :  { %365 = vsyncpa [#allocation4], 1 }

</bundles_post_ra>
